<compile_context>
chip_gen: v5e
topology: v5e:2x2
jax: 0.10.0
libtpu: 0.0.40
codegen_flags: <defaults>
</compile_context>

<pallas_src>
import functools

import jax
import jax.numpy as jnp
from jax import lax
from jax.experimental import pallas as pl
from jax.experimental.pallas import tpu as pltpu


# --------------------------------------------------------------------------- #
# Device / sizing helpers
# --------------------------------------------------------------------------- #
def _vmem_capacity_bytes():
    try:
        return int(pltpu.get_tpu_info().vmem_capacity_bytes)
    except Exception:
        return 128 * 1024 * 1024


def _default_block_budget():
    # ~4 MiB activation blocks on 64 MiB-VMEM parts (v7x), ~8 MiB on 128 MiB
    # parts (v5e/v6e).  Blocks in the multi-MiB range sit near the HBM roofline.
    cap = _vmem_capacity_bytes()
    return (4 << 20) if cap <= (64 << 20) else (8 << 20)


def _vmem_limit(in_block_bytes, out_block_bytes, f32_temp_bytes):
    # 2x double-buffered input + 2x double-buffered output + in-kernel f32 temps
    # + margin for params / small scratch; clamp to physical capacity.
    cap = _vmem_capacity_bytes()
    lim = 2 * in_block_bytes + 2 * out_block_bytes + f32_temp_bytes + (4 << 20)
    lim = max(lim, 16 << 20)
    lim = min(lim, cap - (8 << 20))
    return int(lim)


def _pick_batch_block(n, elem_bytes, budget_bytes):
    """Largest divisor of n whose (bn, C, HW) block fits the budget while keeping
    at least min(n, 4) grid steps so both v7x TensorCores get pipelined work."""
    min_steps = min(n, 4)
    best = 1
    for d in range(1, n + 1):
        if n % d:
            continue
        if d * elem_bytes > budget_bytes:
            continue
        if n // d < min_steps:
            continue
        best = d
    return best


def _pick_hw_tile(hw, c, itemsize, budget_bytes):
    """Largest multiple-of-128 divisor of hw whose (1, C, thw) block fits the
    budget.  Falls back to the full extent if no lane-aligned divisor exists."""
    best = None
    for t in range(128, hw + 1, 128):
        if hw % t:
            continue
        if c * t * itemsize > budget_bytes:
            continue
        best = t
    return best if best is not None else hw


# --------------------------------------------------------------------------- #
# Shared stats -> (scale, shift) math
# --------------------------------------------------------------------------- #
def _scale_shift(s, ss, params, hw, chw, eps):
    """s, ss: (bn, C, 1) per-channel sum / sum-of-squares (f32).
    params: (3, C, 1) = [rho; gamma; beta].  Returns (scale, shift) of (bn, C, 1)."""
    in_mean = s / hw
    in_var = jnp.maximum((ss - s * s / hw) / (hw - 1.0), 0.0)   # ddof=1
    in_inv = lax.rsqrt(in_var + eps)

    ln_s = jnp.sum(s, axis=1, keepdims=True)                    # (bn, 1, 1)
    ln_ss = jnp.sum(ss, axis=1, keepdims=True)
    ln_mean = ln_s / chw
    ln_var = jnp.maximum((ln_ss - ln_s * ln_s / chw) / (chw - 1.0), 0.0)
    ln_inv = lax.rsqrt(ln_var + eps)

    rho, gamma, beta = params[0:1], params[1:2], params[2:3]    # each (1, C, 1)
    mix_inv = rho * in_inv + (1.0 - rho) * ln_inv
    mix_mu = rho * (in_mean * in_inv) + (1.0 - rho) * (ln_mean * ln_inv)
    scale = gamma * mix_inv
    shift = beta - gamma * mix_mu
    return scale, shift


# --------------------------------------------------------------------------- #
# Path A: single-pass fused kernel (whole batch-element slab fits the budget)
# --------------------------------------------------------------------------- #
def _iln_fused_kernel(x_ref, params_ref, o_ref, *, eps, hw_total, c_total):
    hw = float(hw_total)
    chw = float(c_total * hw_total)

    # Upcasts stay inside the expressions (no persistent f32 block copy).
    s = jnp.sum(x_ref[...].astype(jnp.float32), axis=-1, keepdims=True)
    ss = jnp.sum(jnp.square(x_ref[...].astype(jnp.float32)), axis=-1, keepdims=True)

    params = params_ref[...].astype(jnp.float32)                # (3, C, 1)
    scale, shift = _scale_shift(s, ss, params, hw, chw, eps)

    o_ref[...] = (x_ref[...].astype(jnp.float32) * scale + shift).astype(o_ref.dtype)


def _iln_single_pass(x2, params, eps, budget_bytes):
    N, C, HW = x2.shape
    itemsize = x2.dtype.itemsize
    bn = _pick_batch_block(N, C * HW * itemsize, budget_bytes)
    grid = (N // bn,)

    block_bytes = bn * C * HW * itemsize
    block_f32 = bn * C * HW * 4
    vmem_limit = _vmem_limit(block_bytes, block_bytes, 2 * block_f32)

    cost = pl.CostEstimate(
        flops=int(7 * N * C * HW),
        transcendentals=int(2 * N * C),
        bytes_accessed=int(2 * N * C * HW * itemsize),
    )

    return pl.pallas_call(
        functools.partial(_iln_fused_kernel, eps=eps, hw_total=HW, c_total=C),
        out_shape=jax.ShapeDtypeStruct((N, C, HW), x2.dtype),
        grid=grid,
        in_specs=[
            pl.BlockSpec((bn, C, HW), lambda b: (b, 0, 0)),
            pl.BlockSpec((3, C, 1), lambda b: (0, 0, 0)),
        ],
        out_specs=pl.BlockSpec((bn, C, HW), lambda b: (b, 0, 0)),
        compiler_params=pltpu.CompilerParams(
            dimension_semantics=("parallel",),
            vmem_limit_bytes=vmem_limit,
        ),
        cost_estimate=cost,
    )(x2, params)


# --------------------------------------------------------------------------- #
# Path B: two-pass, spatially tiled (large activations / small VMEM)
# --------------------------------------------------------------------------- #
def _iln_reduce_kernel(x_ref, sum_ref, sumsq_ref):
    @pl.when(pl.program_id(1) == 0)
    def _():
        sum_ref[...] = jnp.zeros_like(sum_ref)
        sumsq_ref[...] = jnp.zeros_like(sumsq_ref)

    x = x_ref[...].astype(jnp.float32)                           # (1, C, thw)
    sum_ref[...] += jnp.sum(x, axis=-1, keepdims=True)
    sumsq_ref[...] += jnp.sum(x * x, axis=-1, keepdims=True)


def _iln_apply_kernel(x_ref, sum_ref, sumsq_ref, params_ref, o_ref, *,
                      eps, hw_total, c_total):
    hw = float(hw_total)
    chw = float(c_total * hw_total)

    s = sum_ref[...]                                             # (1, C, 1) f32
    ss = sumsq_ref[...]
    params = params_ref[...].astype(jnp.float32)                 # (3, C, 1)
    scale, shift = _scale_shift(s, ss, params, hw, chw, eps)

    o_ref[...] = (x_ref[...].astype(jnp.float32) * scale + shift).astype(o_ref.dtype)


def _iln_two_pass(x2, params, eps, budget_bytes):
    N, C, HW = x2.shape
    itemsize = x2.dtype.itemsize
    thw = _pick_hw_tile(HW, C, itemsize, budget_bytes)
    n_hw = HW // thw

    block_bytes = C * thw * itemsize
    block_f32 = C * thw * 4

    # Pass 1: per-channel sum / sum-of-squares accumulated over H*W tiles.
    reduce_cost = pl.CostEstimate(
        flops=int(3 * N * C * HW),
        transcendentals=0,
        bytes_accessed=int(N * C * HW * itemsize),
    )
    sums, sumsqs = pl.pallas_call(
        _iln_reduce_kernel,
        out_shape=(
            jax.ShapeDtypeStruct((N, C, 1), jnp.float32),
            jax.ShapeDtypeStruct((N, C, 1), jnp.float32),
        ),
        grid=(N, n_hw),
        in_specs=[pl.BlockSpec((1, C, thw), lambda n, h: (n, 0, h))],
        out_specs=(
            pl.BlockSpec((1, C, 1), lambda n, h: (n, 0, 0)),
            pl.BlockSpec((1, C, 1), lambda n, h: (n, 0, 0)),
        ),
        compiler_params=pltpu.CompilerParams(
            dimension_semantics=("parallel", "arbitrary"),
            vmem_limit_bytes=_vmem_limit(block_bytes, 4 * C * 2, block_f32),
        ),
        cost_estimate=reduce_cost,
    )(x2)

    # Pass 2: stream the fused scale/shift FMA.
    apply_cost = pl.CostEstimate(
        flops=int(2 * N * C * HW),
        transcendentals=int(2 * N * C),
        bytes_accessed=int(2 * N * C * HW * itemsize),
    )
    out = pl.pallas_call(
        functools.partial(_iln_apply_kernel, eps=eps, hw_total=HW, c_total=C),
        out_shape=jax.ShapeDtypeStruct((N, C, HW), x2.dtype),
        grid=(N, n_hw),
        in_specs=[
            pl.BlockSpec((1, C, thw), lambda n, h: (n, 0, h)),
            pl.BlockSpec((1, C, 1), lambda n, h: (n, 0, 0)),
            pl.BlockSpec((1, C, 1), lambda n, h: (n, 0, 0)),
            pl.BlockSpec((3, C, 1), lambda n, h: (0, 0, 0)),
        ],
        out_specs=pl.BlockSpec((1, C, thw), lambda n, h: (n, 0, h)),
        compiler_params=pltpu.CompilerParams(
            dimension_semantics=("parallel", "parallel"),
            vmem_limit_bytes=_vmem_limit(block_bytes, block_bytes, block_f32),
        ),
        cost_estimate=apply_cost,
    )(x2, sums, sumsqs, params)
    return out


# --------------------------------------------------------------------------- #
# Public wrapper (matches ILN.forward)
# --------------------------------------------------------------------------- #
def iln_forward(x, rho, gamma, beta, eps=1e-5, *, block_budget_bytes=None):
    """x: (N, C, H, W); rho/gamma/beta: (1, C, 1, 1).  Matches ILN.forward."""
    N, C, H, W = x.shape
    HW = H * W

    x2 = x.reshape(N, C, HW)                                     # lane-dense layout
    params = jnp.concatenate(
        [rho.reshape(1, C, 1).astype(jnp.float32),
         gamma.reshape(1, C, 1).astype(jnp.float32),
         beta.reshape(1, C, 1).astype(jnp.float32)], axis=0)     # (3, C, 1)

    if block_budget_bytes is None:
        block_budget_bytes = _default_block_budget()

    elem_bytes = C * HW * x.dtype.itemsize
    if elem_bytes <= block_budget_bytes:
        out2 = _iln_single_pass(x2, params, eps, block_budget_bytes)
    else:
        out2 = _iln_two_pass(x2, params, eps, block_budget_bytes)
    return out2.reshape(N, C, H, W)


def iln_reference(x, rho, gamma, beta, eps=1e-5):
    x32 = x.astype(jnp.float32)
    in_mean = jnp.mean(x32, axis=(2, 3), keepdims=True)
    in_var = jnp.var(x32, axis=(2, 3), keepdims=True, ddof=1)
    out_in = (x32 - in_mean) / jnp.sqrt(in_var + eps)
    ln_mean = jnp.mean(x32, axis=(1, 2, 3), keepdims=True)
    ln_var = jnp.var(x32, axis=(1, 2, 3), keepdims=True, ddof=1)
    out_ln = (x32 - ln_mean) / jnp.sqrt(ln_var + eps)
    out = rho * out_in + (1.0 - rho) * out_ln
    return (out * gamma + beta).astype(x.dtype)


if __name__ == "__main__":
    key = jax.random.PRNGKey(0)
    N, C, H, W = 2, 4, 16, 16

    x = jax.random.normal(key, (N, C, H, W), dtype=jnp.float32)

    # ILN.__init__: rho = 0.0, gamma = 1.0, beta = 0.0, each (1, C, 1, 1).
    rho = jnp.zeros((1, C, 1, 1), dtype=jnp.float32)
    gamma = jnp.ones((1, C, 1, 1), dtype=jnp.float32)
    beta = jnp.zeros((1, C, 1, 1), dtype=jnp.float32)

    out = jax.block_until_ready(iln_forward(x, rho, gamma, beta))
    ref = iln_reference(x, rho, gamma, beta)
    assert out.shape == (N, C, H, W)
    assert jnp.allclose(out, ref, atol=1e-4, rtol=1e-4), float(
        jnp.max(jnp.abs(out - ref)))

    # Non-trivial rho/gamma/beta validates the fused scale/shift algebra.
    k1, k2, k3 = jax.random.split(jax.random.PRNGKey(1), 3)
    rho_r = jax.random.uniform(k1, (1, C, 1, 1), dtype=jnp.float32)
    gamma_r = jax.random.normal(k2, (1, C, 1, 1), dtype=jnp.float32)
    beta_r = jax.random.normal(k3, (1, C, 1, 1), dtype=jnp.float32)
    out_r = jax.block_until_ready(iln_forward(x, rho_r, gamma_r, beta_r))
    ref_r = iln_reference(x, rho_r, gamma_r, beta_r)
    assert jnp.allclose(out_r, ref_r, atol=1e-4, rtol=1e-4), float(
        jnp.max(jnp.abs(out_r - ref_r)))

    # Exercise the tiled two-pass path (used when a per-element slab exceeds the
    # VMEM block budget, e.g. realistic UGATIT sizes on v7x) by forcing a tiny
    # budget so the H*W axis is split into lane-aligned tiles.
    out_t = jax.block_until_ready(
        iln_forward(x, rho_r, gamma_r, beta_r, block_budget_bytes=2048))
    assert jnp.allclose(out_t, ref_r, atol=1e-4, rtol=1e-4), float(
        jnp.max(jnp.abs(out_t - ref_r)))

    print("KERNEL_OK")
</pallas_src>

<mosaic_0001>
module attributes {stable_mosaic.version = 11 : i64} {
  func.func @_iln_fused_kernel(%arg0: i32, %arg1: memref<1x4x256xf32, #tpu.memory_space<vmem>>, %arg2: memref<3x4x1xf32, #tpu.memory_space<vmem>>, %arg3: memref<1x4x256xf32, #tpu.memory_space<vmem>>) attributes {dimension_semantics = [#tpu.dimension_semantics<parallel>], iteration_bounds = array<i64: 2>, scalar_prefetch = 0 : i64, scratch_operands = 0 : i64, tpu.core_type = #tpu.core_type<tc>, window_params = [{transform_indices = @transform_0, window_bounds = array<i64: 1, 4, 256>}, {pipeline_mode = #tpu.pipeline_mode<synchronous>, transform_indices = @transform_1, window_bounds = array<i64: 3, 4, 1>}, {transform_indices = @transform_2, window_bounds = array<i64: 1, 4, 256>}]} {
    %c0 = arith.constant 0 : index
    %c0_0 = arith.constant 0 : index
    %c0_1 = arith.constant 0 : index
    %0 = vector.load %arg1[%c0, %c0_0, %c0_1] : memref<1x4x256xf32, #tpu.memory_space<vmem>>, vector<1x4x256xf32>
    %cst = arith.constant dense<0.000000e+00> : vector<1x4xf32>
    %1 = vector.multi_reduction <add>, %0, %cst [2] : vector<1x4x256xf32> to vector<1x4xf32>
    %2 = vector.shape_cast %1 : vector<1x4xf32> to vector<1x4x1xf32>
    %c0_2 = arith.constant 0 : index
    %c0_3 = arith.constant 0 : index
    %c0_4 = arith.constant 0 : index
    %3 = vector.load %arg1[%c0_2, %c0_3, %c0_4] : memref<1x4x256xf32, #tpu.memory_space<vmem>>, vector<1x4x256xf32>
    %4 = arith.mulf %3, %3 : vector<1x4x256xf32>
    %cst_5 = arith.constant dense<0.000000e+00> : vector<1x4xf32>
    %5 = vector.multi_reduction <add>, %4, %cst_5 [2] : vector<1x4x256xf32> to vector<1x4xf32>
    %6 = vector.shape_cast %5 : vector<1x4xf32> to vector<1x4x1xf32>
    %c0_6 = arith.constant 0 : index
    %c0_7 = arith.constant 0 : index
    %c0_8 = arith.constant 0 : index
    %7 = vector.load %arg2[%c0_6, %c0_7, %c0_8] : memref<3x4x1xf32, #tpu.memory_space<vmem>>, vector<3x4x1xf32>
    %cst_9 = arith.constant 2.560000e+02 : f32
    %8 = vector.broadcast %cst_9 : f32 to vector<1x4x1xf32>
    %9 = arith.divf %2, %8 : vector<1x4x1xf32>
    %10 = arith.mulf %2, %2 : vector<1x4x1xf32>
    %cst_10 = arith.constant 2.560000e+02 : f32
    %11 = vector.broadcast %cst_10 : f32 to vector<1x4x1xf32>
    %12 = arith.divf %10, %11 : vector<1x4x1xf32>
    %13 = arith.subf %6, %12 : vector<1x4x1xf32>
    %cst_11 = arith.constant 2.550000e+02 : f32
    %14 = vector.broadcast %cst_11 : f32 to vector<1x4x1xf32>
    %15 = arith.divf %13, %14 : vector<1x4x1xf32>
    %cst_12 = arith.constant 0.000000e+00 : f32
    %16 = vector.broadcast %cst_12 : f32 to vector<1x4x1xf32>
    %17 = arith.maximumf %15, %16 : vector<1x4x1xf32>
    %cst_13 = arith.constant 9.99999974E-6 : f32
    %18 = vector.broadcast %cst_13 : f32 to vector<1x4x1xf32>
    %19 = arith.addf %17, %18 : vector<1x4x1xf32>
    %20 = math.rsqrt %19 : vector<1x4x1xf32>
    %cst_14 = arith.constant dense<0.000000e+00> : vector<1x1xf32>
    %21 = vector.multi_reduction <add>, %2, %cst_14 [1] : vector<1x4x1xf32> to vector<1x1xf32>
    %22 = vector.shape_cast %21 : vector<1x1xf32> to vector<1x1x1xf32>
    %cst_15 = arith.constant dense<0.000000e+00> : vector<1x1xf32>
    %23 = vector.multi_reduction <add>, %6, %cst_15 [1] : vector<1x4x1xf32> to vector<1x1xf32>
    %24 = vector.shape_cast %23 : vector<1x1xf32> to vector<1x1x1xf32>
    %cst_16 = arith.constant 1.024000e+03 : f32
    %25 = vector.broadcast %cst_16 : f32 to vector<1x1x1xf32>
    %26 = arith.divf %22, %25 : vector<1x1x1xf32>
    %27 = arith.mulf %22, %22 : vector<1x1x1xf32>
    %cst_17 = arith.constant 1.024000e+03 : f32
    %28 = vector.broadcast %cst_17 : f32 to vector<1x1x1xf32>
    %29 = arith.divf %27, %28 : vector<1x1x1xf32>
    %30 = arith.subf %24, %29 : vector<1x1x1xf32>
    %cst_18 = arith.constant 1.023000e+03 : f32
    %31 = vector.broadcast %cst_18 : f32 to vector<1x1x1xf32>
    %32 = arith.divf %30, %31 : vector<1x1x1xf32>
    %cst_19 = arith.constant 0.000000e+00 : f32
    %33 = vector.broadcast %cst_19 : f32 to vector<1x1x1xf32>
    %34 = arith.maximumf %32, %33 : vector<1x1x1xf32>
    %cst_20 = arith.constant 9.99999974E-6 : f32
    %35 = vector.broadcast %cst_20 : f32 to vector<1x1x1xf32>
    %36 = arith.addf %34, %35 : vector<1x1x1xf32>
    %37 = math.rsqrt %36 : vector<1x1x1xf32>
    %38 = vector.extract_strided_slice %7 {offsets = [0, 0, 0], sizes = [1, 4, 1], strides = [1, 1, 1]} : vector<3x4x1xf32> to vector<1x4x1xf32>
    %39 = vector.extract_strided_slice %7 {offsets = [1, 0, 0], sizes = [1, 4, 1], strides = [1, 1, 1]} : vector<3x4x1xf32> to vector<1x4x1xf32>
    %40 = vector.extract_strided_slice %7 {offsets = [2, 0, 0], sizes = [1, 4, 1], strides = [1, 1, 1]} : vector<3x4x1xf32> to vector<1x4x1xf32>
    %41 = arith.mulf %38, %20 : vector<1x4x1xf32>
    %cst_21 = arith.constant 1.000000e+00 : f32
    %42 = vector.broadcast %cst_21 : f32 to vector<1x4x1xf32>
    %43 = arith.subf %42, %38 : vector<1x4x1xf32>
    %44 = vector.broadcast %37 : vector<1x1x1xf32> to vector<1x4x1xf32>
    %45 = arith.mulf %43, %44 : vector<1x4x1xf32>
    %46 = arith.addf %41, %45 : vector<1x4x1xf32>
    %47 = arith.mulf %9, %20 : vector<1x4x1xf32>
    %48 = arith.mulf %38, %47 : vector<1x4x1xf32>
    %cst_22 = arith.constant 1.000000e+00 : f32
    %49 = vector.broadcast %cst_22 : f32 to vector<1x4x1xf32>
    %50 = arith.subf %49, %38 : vector<1x4x1xf32>
    %51 = arith.mulf %26, %37 : vector<1x1x1xf32>
    %52 = vector.broadcast %51 : vector<1x1x1xf32> to vector<1x4x1xf32>
    %53 = arith.mulf %50, %52 : vector<1x4x1xf32>
    %54 = arith.addf %48, %53 : vector<1x4x1xf32>
    %55 = arith.mulf %39, %46 : vector<1x4x1xf32>
    %56 = arith.mulf %39, %54 : vector<1x4x1xf32>
    %57 = arith.subf %40, %56 : vector<1x4x1xf32>
    %c0_23 = arith.constant 0 : index
    %c0_24 = arith.constant 0 : index
    %c0_25 = arith.constant 0 : index
    %58 = vector.load %arg1[%c0_23, %c0_24, %c0_25] : memref<1x4x256xf32, #tpu.memory_space<vmem>>, vector<1x4x256xf32>
    %59 = vector.broadcast %55 : vector<1x4x1xf32> to vector<1x4x256xf32>
    %60 = arith.mulf %58, %59 : vector<1x4x256xf32>
    %61 = vector.broadcast %57 : vector<1x4x1xf32> to vector<1x4x256xf32>
    %62 = arith.addf %60, %61 : vector<1x4x256xf32>
    %c0_26 = arith.constant 0 : index
    %c0_27 = arith.constant 0 : index
    %c0_28 = arith.constant 0 : index
    %63 = vector.load %arg3[%c0_26, %c0_27, %c0_28] : memref<1x4x256xf32, #tpu.memory_space<vmem>>, vector<1x4x256xf32>
    tpu.vector_store %arg3[%c0_26, %c0_27, %c0_28], %62 {strides = array<i32>} : memref<1x4x256xf32, #tpu.memory_space<vmem>>, vector<1x4x256xf32>,
    return
  }
  func.func @transform_0(%arg0: i32) -> (i32, i32, i32) {
    %c0_i32 = arith.constant 0 : i32
    %c0_i32_0 = arith.constant 0 : i32
    %c0_i32_1 = arith.constant 0 : i32
    return %arg0, %c0_i32, %c0_i32_0 : i32, i32, i32
  }
  func.func @transform_1(%arg0: i32) -> (i32, i32, i32) {
    %c0_i32 = arith.constant 0 : i32
    %c0_i32_0 = arith.constant 0 : i32
    %c0_i32_1 = arith.constant 0 : i32
    %c0_i32_2 = arith.constant 0 : i32
    return %c0_i32, %c0_i32_0, %c0_i32_1 : i32, i32, i32
  }
  func.func @transform_2(%arg0: i32) -> (i32, i32, i32) {
    %c0_i32 = arith.constant 0 : i32
    %c0_i32_0 = arith.constant 0 : i32
    %c0_i32_1 = arith.constant 0 : i32
    return %arg0, %c0_i32, %c0_i32_0 : i32, i32, i32
  }
}

</mosaic_0001>

<bundles_post_ra>
// kernel: tpu_custom_call.1
= control target key start
LH: loop header
LB: loop body
LE: loop exit
PB: predicated region body
PF: predicated region fallthrough
CT: control target
= control target key end

     0   :  { %7 = vsyncpa [#allocation3], 0  ;;  %s745_s0 = inlined_call_operand.hbm [shape: f32[2,4,256], index: 0, kind: input, shape index: {}]   ;;  %s746_s1 = inlined_call_operand.vmem [shape: f32[3,4,1], index: 1, kind: input, shape index: {}]   ;;  %s747_s2 = inlined_call_operand.hbm [shape: f32[2,4,256], index: 2, kind: output, shape index: {}]  }
   0x1   :  { %9 = vsyncpa [#allocation3 + $0x1], 0 }
   0x2   :  { %10 = vsyncpa [#allocation4], 0 }
   0x3   :  { %12 = vsyncpa [#allocation4 + $0x1], 0  ;;  %s587_s9 = smov 0   ;;  %s589_s10 = smov 0  }
   0x4   :  { %s591_s11 = smov 0   ;;  %s593_s12 = smov 0  }
   0x5 LB: > { %s608_s13 = sadd.s32 4294967295, %s564_s12   ;;  %s386_s14 = sadd.s32 4294967294, %s564_s12   ;;  %s564_s12 = sphi %s593_s12, %s757_s12   ;;  %s560_s11 = sphi %s591_s11, %s756_s11   ;;  %s556_s10 = sphi %s589_s10, %s755_s10   ;;  %s552_s9 = sphi %s587_s9, %s754_s9  }
   0x6   : > { %s612_s15 = sadd.s32 1, %s564_s12   ;;  %s25_s16 = sadd.s32 1, %s560_s11 }
   0x7   : > { %s22_s17 = ssub.s32 %s564_s12, %s612_s15  ;;  %p32_p0 = scmp.ne.s32.totalorder %s560_s11, %s556_s10 }
   0x8   : > { %p23_p1 = scmp.eq.s32.totalorder %s22_s17, 0  ;;  %p33_p2 = scmp.eq.s32.totalorder %s564_s12, 0 }
   0x9   : > { %p38_p3 = scmp.ne.s32.totalorder %s556_s10, %s552_s9  ;;  %p39_p4 = scmp.eq.s32.totalorder %s608_s13, 0 }
   0xa   : > { %s624_s18 = scalar_select %p23_p1, %s560_s11, %s25_s16  }
   0xb   : > { %p626_p5 = por %p33_p2, %p32_p0  ;;  %p630_p6 = por %p39_p4, %p38_p3 }
   0xc   : > { %p83_p7 = scmp.eq.s32.totalorder %s608_s13, 1  ;;  %p89_p8 = scmp.eq.s32.totalorder %s386_s14, 1 }
   0xd   : > { %p414_p10 = scmp.lt.s32.totalorder %s564_s12, 2  ;;  %s112_s23 = sand.u32 1, %s560_s11  }
   0xe   : > { %p637_p11 = por %p83_p7, %p32_p0  ;;  %p641_p12 = por %p89_p8, %p38_p3 }
   0xf   : > { %s400_s24 = sshll.u32 %s564_s12, 3  ;;  %s389_s25 = sshll.u32 %s112_s23, 3 }
  0x10   : > { %s121_s28 = scalar_lea.hbm %s745_s0, %s400_s24  ;;  %s116_s30 = scalar_lea.vmem [#allocation2], %s389_s25 }
  0x11   : > { %s123_s29 = sshll.u32 %s121_s28, 4  ;;  %s125_s3 = sshll.u32 %s116_s30, 4  ;;  %s124_s29 = int_to_ptr.hbm [resolvable:$true] %s123_s29  ;;  %s126_s3 = int_to_ptr.vmem [resolvable:$true] %s125_s3 }
  0x12   : > { %p652_p13 = pnand %p414_p10, %p626_p5  ;;  %p392_p0 = scmp.ge.s32.totalorder %s564_s12, 1 }
  0x13   : > { %p130_p1 = scmp.lt.s32.totalorder %s564_s12, 3  ;;  %s113_s5 = scalar_lea.sflag [#allocation3], %s112_s23 }
  0x14   : > { %s468_s6 = sshra.s32 %s124_s29, 4  ;;  %p472_p3 = pneg %p652_p13  ;;  %s469_s6 = int_to_ptr.hbm [resolvable:$true] %s468_s6 }
  0x15   : > { %s470_s7 = scalar_lea.hbm %s469_s6, 8  ;;  %s475_s16 = scalar_lea.hbm %s745_s0, 16 }
  0x16   : > { %p471_p2 = scmp.ne.s32.totalorder %s469_s6, %s470_s7  ;;  %p476_p5 = scmp.lt.s32.totalorder %s469_s6, %s745_s0 }
  0x17   : > { %p477_p8 = scmp.lt.s32.totalorder %s475_s16, %s470_s7 }
  0x18   : > { %p473_p4 = pnand %p472_p3, %p471_p2 }
  0x19   : > { %p478_p10 = por %p477_p8, %p476_p5 }
  0x1a   : > { %p474_p7 = pneg %p473_p4 }
  0x1c   : > { %p479_p9 = pnand %p478_p10, %p474_p7 }
  0x1e   : > { %482 = shalt.err (!%p479_p9)
}
  0x1f   : > { %409 = dma.hbm_to_vmem [thread:$0]  (!%p652_p13), %s124_s29, 128, %s126_s3, %s113_s5  }
  0x20   : > { %p131_p2 = pnand %p392_p0, %p130_p1 }
  0x21   : > { %s673_s23 = sand.u32 (!%p131_p2), 1, %s556_s10  }
  0x22   : > { %134 = sbr.rel (%p131_p2) target bundleno = 351 (0x15f), region = 28  ;;  %s393_s24 = sshll.u32 (!%p131_p2), %s673_s23, 3 }
  0x23   : > { %s137_s25 = scalar_lea.sflag (!%p131_p2), [#allocation3], %s673_s23  ;;  %s140_s26 = scalar_lea.vmem (!%p131_p2), [#allocation2], %s393_s24 }
  0x27   : > { %543 = dma.done.wait (%p630_p6), %s137_s25, 128  }
  0x28   : > { %545 = vsyncadd (%p630_p6), %s137_s25, 4294967168  ;;  %v683_v0 = vld [vmem:[%s140_s26] sm:$0xff]  ;;  %vm169_vm0 = vcmask 1043456   ;;  %v566_v12 = vmov 256.0   ;;  %v567_v13 = vmov 255.0   ;;  %v568_v19 = vmov 1024.0  }
  0x29   : > { %164 = vst [vmem:[#allocation1] ss:$2 sm:$0xff] %v683_v0  ;;  %v175_v1 = vmul.f32 %v683_v0, %v683_v0  ;;  %456 = vrcp.f32 %v566_v12  ;;  %v569_v21 = vmov 1023.0   ;;  %v570_v37 = vmov 0   ;;  %s401_s4 = sshll.u32 %s608_s13, 3  ;;  %s161_s8 = scalar_lea.vmem [#allocation5], %s393_s24 }
  0x2a   : > { %458 = vrcp.f32 %v567_v13  ;;  %454 = vset.pattern.permute.xlu1 %v570_v37  ;;  %455 = vset.pattern.permute.xlu0 %v570_v37  ;;  %v571_v37 = vmov 839922192   ;;  %s311_s7 = scalar_lea.hbm %s747_s2, %s401_s4  ;;  %s313_s14 = sshll.u32 %s161_s8, 4  ;;  %s314_s14 = int_to_ptr.vmem [resolvable:$true] %s313_s14 }
  0x2b   : > { %460 = vrcp.f32 %v568_v19  ;;  %s315_s16 = sshll.u32 %s311_s7, 4  ;;  %s300_s17 = scalar_lea.sflag [#allocation4], %s673_s23  ;;  %s316_s16 = int_to_ptr.hbm [resolvable:$true] %s315_s16 }
  0x2c   : > { %462 = vrcp.f32 %v569_v21  ;;  %s512_s13 = sshra.s32 %s316_s16, 4  ;;  %s518_s24 = scalar_lea.hbm %s747_s2, 16  ;;  %s513_s13 = int_to_ptr.hbm [resolvable:$true] %s512_s13 }
  0x2d   : > { %s514_s19 = scalar_lea.hbm %s513_s13, 8  ;;  %p519_p0 = scmp.lt.s32.totalorder %s513_s13, %s747_s2 }
  0x2e   : > { %p515_p6 = scmp.ne.s32.totalorder %s513_s13, %s514_s19  ;;  %p520_p1 = scmp.lt.s32.totalorder %s518_s24, %s514_s19 }
  0x2f   : > { %v457_v14 = vpop.eup %456 }
  0x30   : > { %v165_v2 = vld.sshfl [vmem:[#allocation1] sm:$0xff pattern:$0x75316420]  ;;  %v166_v3 = vld.sshfl [vmem:[#allocation1 + $0x8] sm:$0xff pattern:$0x75316420]  ;;  %v459_v15 = vpop.eup %458  ;;  %vm195_vm1 = vweird.f32 %v457_v14  ;;  %p516_p9 = pnand %p515_p6, %p637_p11  ;;  %p521_p3 = por %p520_p1, %p519_p0 }
  0x31   : > { %v170_v4 = vsel %vm169_vm0, %v165_v2, 0.0  ;;  %v171_v5 = vsel %vm169_vm0, %v166_v3, 0.0  ;;  %177 = vst [vmem:[#allocation1] ss:$2 sm:$0xff] %v175_v1  ;;  %v191_v16 = vmul.f32 256.0, %v457_v14  ;;  %v202_v17 = vmul.f32 255.0, %v459_v15  ;;  %v461_v23 = vpop.eup %460 }
  0x32   : > { %v172_v6 = vadd.f32 %v171_v5, %v170_v4  ;;  %v463_v27 = vpop.eup %462  ;;  %v236_v31 = vmul.f32 1024.0, %v461_v23  ;;  %vm206_vm2 = vweird.f32 %v459_v15  ;;  %vm240_vm3 = vweird.f32 %v461_v23  ;;  %p517_p13 = pneg %p516_p9 }
  0x33   : > { %v192_v18 = vsub.f32 1.0, %v191_v16  ;;  %v203_v20 = vsub.f32 1.0, %v202_v17  ;;  %v247_v34 = vmul.f32 1023.0, %v463_v27  ;;  %vm251_vm4 = vweird.f32 %v463_v27  ;;  %v187_v16 = vld [vmem:[%s746_s1] sm:$0xf] }
  0x34   : > { %173 = vadd.xlane.f32.xlu0 %v172_v6  ;;  %v237_v39 = vsub.f32 1.0, %v236_v31  ;;  %p522_p4 = pnand %p521_p3, %p517_p13 }
  0x35   : > { %v193_v22 = vmul.f32 %v457_v14, %v192_v18  ;;  %v204_v25 = vmul.f32 %v459_v15, %v203_v20  ;;  %v248_v43 = vsub.f32 1.0, %v247_v34  ;;  %v267_v20 = vsub.f32 1.0, %v187_v16 }
  0x36   : > { %v238_v48 = vmul.f32 %v461_v23, %v237_v39 }
  0x37   : > { %v194_v28 = vadd.f32 %v457_v14, %v193_v22  ;;  %v205_v33 = vadd.f32 %v459_v15, %v204_v25  ;;  %v249_v52 = vmul.f32 %v463_v27, %v248_v43 }
  0x38   : > { %v178_v7 = vld.sshfl [vmem:[#allocation1] sm:$0xff pattern:$0x75316420]  ;;  %v179_v8 = vld.sshfl [vmem:[#allocation1 + $0x8] sm:$0xff pattern:$0x75316420]  ;;  %v239_v55 = vadd.f32 %v461_v23, %v238_v48 }
  0x39   : > { %v182_v9 = vsel %vm169_vm0, %v178_v7, 0.0  ;;  %v183_v10 = vsel %vm169_vm0, %v179_v8, 0.0  ;;  %v196_v35 = vsel %vm195_vm1, %v457_v14, %v194_v28  ;;  %v207_v41 = vsel %vm206_vm2, %v459_v15, %v205_v33 }
  0x3a   : > { %v184_v11 = vadd.f32 %v183_v10, %v182_v9  ;;  %v250_v59 = vadd.f32 %v463_v27, %v249_v52  ;;  %v241_v61 = vsel %vm240_vm3, %v461_v23, %v239_v55 }
  0x3c   : > { %185 = vadd.xlane.f32.xlu0 %v184_v11  ;;  %v252_v1 = vsel %vm251_vm4, %v463_v27, %v250_v59 }
  0xa7   : > { %v692_v24 = vpop.xlane.xlu0 %173 }
  0xa8   : > { %v221_v26 = vsel %vm169_vm0, %v692_v24, 0.0  ;;  %v198_v30 = vmul.f32 %v692_v24, %v692_v24  ;;  %v197_v19 = vmul.f32 %v196_v35, %v692_v24 }
  0xa9   : > { %v222_v29 = vrot.slane %v221_v26, 4 }
  0xaa   : > { %v199_v38 = vmul.f32 %v198_v30, %v196_v35  ;;  %v189_v35 = vld [vmem:[%s746_s1 + $0x8] sm:$0xf] }
  0xab   : > { %v223_v32 = vadd.f32 %v222_v29, %v221_v26  ;;  %v188_v29 = vld [vmem:[%s746_s1 + $0x4] sm:$0xf] }
  0xad   : > { %v224_v36 = vrot.slane %v223_v32, 2 }
  0xaf   : > { %v225_v40 = vadd.f32 %v224_v36, %v223_v32  ;;  %v186_v42 = vpop.xlane.xlu0 %185 }
  0xb0   : > { %v200_v44 = vsub.f32 %v186_v42, %v199_v38  ;;  %v228_v45 = vsel %vm169_vm0, %v186_v42, 0.0  ;;  %v283_v38 = vunpack.c.l.s4 %v571_v37 }
  0xb1   : > { %v226_v46 = vrot.slane %v225_v40, 1  ;;  %v229_v47 = vrot.slane %v228_v45, 4 }
  0xb2   : > { %v208_v49 = vmul.f32 %v207_v41, %v200_v44 }
  0xb3   : > { %v227_v50 = vadd.f32 %v226_v46, %v225_v40  ;;  %v230_v51 = vadd.f32 %v229_v47, %v228_v45  ;;  %v284_v40 = vunpack.c.0.s8 %v283_v38 }
  0xb4   : > { %v209_v53 = vmax.f32 %v208_v49, 0.0 }
  0xb5   : > { %v231_v54 = vrot.slane %v230_v51, 2  ;;  %v243_v57 = vmul.f32 %v227_v50, %v227_v50  ;;  %v242_v22 = vmul.f32 %v241_v61, %v227_v50 }
  0xb6   : > { %v210_v56 = vadd.f32 1e-05, %v209_v53 }
  0xb7   : > { %v232_v58 = vadd.f32 %v231_v54, %v230_v51  ;;  %v244_v62 = vmul.f32 %v243_v57, %v241_v61 }
  0xb8   : > { %464 = vrsqrt.f32 %v210_v56  ;;  %vm217_vm6 = vweird.f32 %v210_v56 }
  0xb9   : > { %v233_v60 = vrot.slane %v232_v58, 1 }
  0xbb   : > { %v234_v63 = vadd.f32 %v233_v60, %v232_v58 }
  0xbd   : > { %v245_v2 = vsub.f32 %v234_v63, %v244_v62 }
  0xbe   : > { %v465_v3 = vpop.eup %464 }
  0xbf   : > { %v212_v4 = vmul.f32 %v465_v3, %v210_v56  ;;  %v253_v5 = vmul.f32 %v252_v1, %v245_v2  ;;  %vm218_vm5 = vweird.f32 %v465_v3 }
  0xc0   : > { %vm219_vm7 = vmor %vm217_vm6, %vm218_vm5 }
  0xc1   : > { %v254_v6 = vmax.f32 %v253_v5, 0.0  ;;  %v213_v7 = vmul.f32 %v465_v3, %v212_v4 }
  0xc3   : > { %v255_v8 = vadd.f32 1e-05, %v254_v6  ;;  %v214_v9 = vmul.f32 0.5, %v213_v7 }
  0xc5   : > { %466 = vrsqrt.f32 %v255_v8  ;;  %v215_v10 = vsub.f32 1.5, %v214_v9  ;;  %vm262_vm9 = vweird.f32 %v255_v8 }
  0xc7   : > { %v216_v13 = vmul.f32 %v465_v3, %v215_v10 }
  0xc9   : > { %v220_v17 = vsel %vm219_vm7, %v465_v3, %v216_v13 }
  0xca   : > { %v270_v23 = vmul.f32 %v220_v17, %v197_v19  ;;  %v266_v26 = vmul.f32 %v220_v17, %v187_v16 }
  0xcb   : > { %v467_v11 = vpop.eup %466 }
  0xcc   : > { %v257_v12 = vmul.f32 %v467_v11, %v255_v8  ;;  %vm263_vm8 = vweird.f32 %v467_v11  ;;  %v271_v31 = vmul.f32 %v270_v23, %v187_v16 }
  0xcd   : > { %vm264_vm10 = vmor %vm262_vm9, %vm263_vm8 }
  0xce   : > { %v258_v14 = vmul.f32 %v467_v11, %v257_v12 }
  0xd0   : > { %v259_v15 = vmul.f32 0.5, %v258_v14 }
  0xd2   : > { %v260_v18 = vsub.f32 1.5, %v259_v15 }
  0xd4   : > { %v261_v21 = vmul.f32 %v467_v11, %v260_v18 }
  0xd6   : > { %v265_v25 = vsel %vm264_vm10, %v467_v11, %v261_v21 }
  0xd7   : > { %v268_v27 = vmul.f32 %v267_v20, %v265_v25  ;;  %v272_v28 = vmul.f32 %v265_v25, %v242_v22 }
  0xd9   : > { %v269_v30 = vadd.f32 %v268_v27, %v266_v26  ;;  %v273_v32 = vmul.f32 %v272_v28, %v267_v20 }
  0xdb   : > { %v274_v24 = vadd.f32 %v273_v32, %v271_v31  ;;  %v275_v33 = vmul.f32 %v269_v30, %v188_v29 }
  0xdd   : > { %280 = vperm.xlu1 %454, %v275_v33   ;;  %v276_v34 = vmul.f32 %v274_v24, %v188_v29 }
  0xdf   : > { %v277_v36 = vsub.f32 %v189_v35, %v276_v34 }
  0xe5   : > { %290 = vperm.xlu1 %454, %v277_v36  }
 0x14f   : > { %v281_v39 = vpop.permute.xlu1 %280 }
 0x150   : > { %v285_v41 = vperm.slane %v281_v39, %v284_v40 }
 0x152   : > { %v287_v43 = vmul.f32 %v285_v41, %v683_v0 }
 0x157   : > { %v291_v42 = vpop.permute.xlu1 %290 }
 0x158   : > { %v295_v44 = vperm.slane %v291_v42, %v284_v40 }
 0x15a   : > { %v297_v45 = vadd.f32 %v295_v44, %v287_v43 }
 0x15c   : > { %298 = vst [vmem:[%s161_s8] sm:$0xff] %v297_v45 }
 0x15d   : > { %525 = shalt.err (!%p522_p4)
}
 0x15e   : > { %404 = dma.vmem_to_hbm [thread:$0]  (%p637_p11), %s314_s14, 128, %s316_s16, %s300_s17  }
 0x15f PF: > { %s327_s23 = sand.u32 1, %s552_s9   ;;  %p753_p7 = scmp.ge.s32.totalorder %s564_s12, 2 }
 0x160   : > { %s328_s28 = scalar_lea.sflag [#allocation4], %s327_s23 }
 0x161   : > { %p411_p5 = pnand %p753_p7, %p641_p12 }
 0x163   : > { %p412_p8 = pneg %p411_p5 }
 0x165   : > { %547 = dma.done.wait (%p412_p8), %s328_s28, 128  }
 0x166   : > { %549 = vsyncadd (%p412_p8), %s328_s28, 4294967168  ;;  %p15_p10 = scmp.ge.s32.totalorder %s612_s15, 4   ;;  %s754_s9 = smov %s556_s10 }
 0x167   : > { %s755_s10 = smov %s560_s11  ;;  %s756_s11 = smov %s624_s18 }
 0x168   : > { %s757_s12 = smov %s612_s15  ;;  %17 = sbr.rel (!%p15_p10) target bundleno = 5 (0x5), region = 73 }
 0x16d   :  { %334 = vsyncpa [#allocation3], 1 }
 0x16e   :  { %336 = vsyncpa [#allocation3 + $0x1], 1 }
 0x16f   :  { %337 = vsyncpa [#allocation4], 1 }
 0x170   :  { %339 = vsyncpa [#allocation4 + $0x1], 1 }

</bundles_post_ra>
